<compile_context>
chip_gen: v7x
topology: tpu7x:2x2x1
jax: 0.10.0
libtpu: 0.0.40
codegen_flags: <defaults>
</compile_context>

<pallas_src>
import functools

import jax
import jax.numpy as jnp
from jax.experimental import pallas as pl
from jax.experimental.pallas import tpu as pltpu

BN_EPS = 1e-5

# Logical and lane-padded layer widths.
D_IN = 300                 # 3*10*10 (full-extent block on the last dim, no K padding)
H1, H1P = 150, 256         # hidden 1: 150 -> 256
H2, H2P = 100, 128         # hidden 2: 100 -> 128
D_OUT, D_OUTP = 100, 128   # output:   100 -> 128 (lane-dense, unmasked stores)
B_TOTAL = H1P + H2P + D_OUTP   # concatenated bias width = 512


def _round_up(x, m):
    return -(-x // m) * m


def _mlp_kernel(x_ref, w1_ref, w2_ref, w3_ref, b_ref, out_ref):
    """Fused 3-layer MLP (BN pre-folded) + ReLU, one batch tile per grid step."""
    # Cast the activation tile in VMEM (no wrapper-side HBM pass); no-op when
    # x is already in the weights' dtype.
    x = x_ref[...].astype(w1_ref.dtype)              # (TB, 300)
    b1 = b_ref[:, 0:H1P]                              # biases stay f32
    b2 = b_ref[:, H1P:H1P + H2P]
    b3 = b_ref[:, H1P + H2P:B_TOTAL]

    # Linear(300,150)+BN+ReLU (+Dropout eval = id), padded to 256 columns.
    # f32 accumulator, f32 bias add, f32 ReLU; only the MXU operands are bf16.
    h = jnp.dot(x, w1_ref[...], preferred_element_type=jnp.float32) + b1
    h = jnp.maximum(h, 0.0).astype(w2_ref.dtype)      # padded cols stay exactly 0

    # Linear(150,100)+BN+ReLU, padded to 128 columns (zero rows kill padding).
    h = jnp.dot(h, w2_ref[...], preferred_element_type=jnp.float32) + b2
    h = jnp.maximum(h, 0.0).astype(w3_ref.dtype)

    # Linear(100,100), padded to 128 columns -> unmasked lane-dense store.
    out = jnp.dot(h, w3_ref[...], preferred_element_type=jnp.float32) + b3
    out_ref[...] = out.astype(out_ref.dtype)


def prepare_kernel_params(params, compute_dtype=jnp.bfloat16):
    """Fold eval-mode BatchNorms into the Linear layers and zero-pad to lane
    multiples.  Done once, outside the kernel.  Weights are stored in
    `compute_dtype` (bf16 default -> ~4x MXU throughput on v5e, halved weight
    DMA everywhere); biases stay f32 (added to the f32 accumulator)."""
    s1 = params["g1"] * jax.lax.rsqrt(params["v1"] + BN_EPS)        # (1,150)
    w1f = params["w1"] * s1                                         # (300,150)
    b1f = (params["b1"] - params["m1"]) * s1 + params["be1"]        # (1,150)

    s2 = params["g2"] * jax.lax.rsqrt(params["v2"] + BN_EPS)        # (1,100)
    w2f = params["w2"] * s2                                         # (150,100)
    b2f = (params["b2"] - params["m2"]) * s2 + params["be2"]        # (1,100)

    w1p = jnp.zeros((D_IN, H1P), jnp.float32).at[:, :H1].set(w1f)
    w2p = jnp.zeros((H1P, H2P), jnp.float32).at[:H1, :H2].set(w2f)
    w3p = jnp.zeros((H2P, D_OUTP), jnp.float32).at[:H2, :D_OUT].set(params["w3"])

    bias = jnp.zeros((1, B_TOTAL), jnp.float32)
    bias = bias.at[:, :H1].set(b1f)
    bias = bias.at[:, H1P:H1P + H2].set(b2f)
    bias = bias.at[:, H1P + H2P:H1P + H2P + D_OUT].set(params["b3"])

    return {
        "w1": w1p.astype(compute_dtype),
        "w2": w2p.astype(compute_dtype),
        "w3": w3p.astype(compute_dtype),
        "bias": bias,  # kept f32, added to the f32 MXU accumulator
    }


def _pick_tb(B, tb):
    """Batch-tile heuristic:
      * multiple of 8 (sublane rule), capped at `tb`;
      * >= 2 tiles whenever B >= 16 so v7x's two TensorCores both run;
      * prefer a tile dividing the 8-rounded batch so jnp.pad isn't a full
        HBM copy of x; fall back to the cap (accept the pad) if only tiny
        divisors exist (per-step overhead would dominate otherwise)."""
    B8 = _round_up(B, 8)
    cap = min(tb, max(8, _round_up(-(-B // 2), 8)))
    best = 8
    for cand in range(cap, 7, -8):
        if B8 % cand == 0:
            best = cand
            break
    if best * 4 < cap:
        return cap
    return best


def _forward_padded(x, kparams, tb):
    """Core pallas_call.  Returns the padded, lane-dense (B_pad, 128) f32 buffer."""
    B = x.shape[0]
    # Row-major flatten (matches torch .view(B,-1)); free inside the jit.
    # Deliberately NO .astype here: casting x in the wrapper would be a full
    # extra HBM read+write of the activation stream.
    x_flat = x.reshape(B, -1)

    TB = _pick_tb(B, tb)
    n_tiles = -(-B // TB)
    B_pad = n_tiles * TB
    if B_pad != B:
        # Full HBM copy of x; only taken when B isn't a multiple of TB (the
        # tile picker avoids this for large, nicely-divisible batches).
        x_flat = jnp.pad(x_flat, ((0, B_pad - B), (0, 0)))

    return pl.pallas_call(
        _mlp_kernel,
        out_shape=jax.ShapeDtypeStruct((B_pad, D_OUTP), jnp.float32),
        grid_spec=pltpu.PrefetchScalarGridSpec(
            num_scalar_prefetch=0,
            grid=(n_tiles,),
            in_specs=[
                pl.BlockSpec((TB, D_IN), lambda i: (i, 0)),          # streamed
                # Resident operands (constant index_map -> DMA'd once).  Default
                # double-buffering only costs ~0.25 MB at bf16, so single
                # buffering is skipped; vmem_limit_bytes below covers v5e.
                pl.BlockSpec((D_IN, H1P), lambda i: (0, 0)),          # resident
                pl.BlockSpec((H1P, H2P), lambda i: (0, 0)),           # resident
                pl.BlockSpec((H2P, D_OUTP), lambda i: (0, 0)),        # resident
                pl.BlockSpec((1, B_TOTAL), lambda i: (0, 0)),         # resident
            ],
            out_specs=pl.BlockSpec((TB, D_OUTP), lambda i: (i, 0)),
        ),
        compiler_params=pltpu.CompilerParams(
            dimension_semantics=("parallel",),       # 2-TC sharding on v7x
            vmem_limit_bytes=32 * 1024 * 1024,       # TB<=2048 fits on v5e too
        ),
    )(x_flat, kparams["w1"], kparams["w2"], kparams["w3"], kparams["bias"])


@functools.partial(jax.jit, static_argnames=("tb",))
def linear_forward_padded(x, kparams, tb=1024):
    """Perf entry point: returns the (B_pad, 128) buffer so the [:B,:100]
    slice/reshape can fuse into the consumer instead of a standalone HBM pass."""
    return _forward_padded(x, kparams, tb)


@functools.partial(jax.jit, static_argnames=("tb",))
def linear_forward(x, kparams, tb=1024):
    """Drop-in module semantics: x (B,3,10,10) -> (B,10,10)."""
    B = x.shape[0]
    out = _forward_padded(x, kparams, tb)
    return out[:B, :D_OUT].reshape(B, 10, 10)


def init_params(key):
    """Shapes/init matching the PyTorch module.
    Linear weights: kaiming_normal_ (std = sqrt(2 / fan_in)), biases = 0.
    BatchNorm: gamma=1, beta=0, running_mean=0, running_var=1.
    Weights stored transposed: (in, out)."""
    k1, k2, k3 = jax.random.split(key, 3)

    def kaiming(k, fan_in, fan_out):
        std = (2.0 / fan_in) ** 0.5
        return jax.random.normal(k, (fan_in, fan_out), jnp.float32) * std

    def row(v, n):
        return jnp.full((1, n), v, jnp.float32)

    return {
        "w1": kaiming(k1, 300, 150), "b1": row(0.0, 150),
        "g1": row(1.0, 150), "be1": row(0.0, 150), "m1": row(0.0, 150), "v1": row(1.0, 150),
        "w2": kaiming(k2, 150, 100), "b2": row(0.0, 100),
        "g2": row(1.0, 100), "be2": row(0.0, 100), "m2": row(0.0, 100), "v2": row(1.0, 100),
        "w3": kaiming(k3, 100, 100), "b3": row(0.0, 100),
    }


def reference_forward(x, params):
    """Pure-JAX reference (unfolded, unpadded, f32) for sanity checking."""
    B = x.shape[0]
    h = x.reshape(B, -1)
    h = h @ params["w1"] + params["b1"]
    h = (h - params["m1"]) * jax.lax.rsqrt(params["v1"] + BN_EPS) * params["g1"] + params["be1"]
    h = jnp.maximum(h, 0.0)
    h = h @ params["w2"] + params["b2"]
    h = (h - params["m2"]) * jax.lax.rsqrt(params["v2"] + BN_EPS) * params["g2"] + params["be2"]
    h = jnp.maximum(h, 0.0)
    h = h @ params["w3"] + params["b3"]
    return h.reshape(B, 10, 10)


if __name__ == "__main__":
    key = jax.random.PRNGKey(0)
    kx, kp = jax.random.split(key)

    B = 16                                            # batch_size from the spec
    x = jax.random.normal(kx, (B, 3, 10, 10), jnp.float32)   # NCHW, as in torch
    params = init_params(kp)
    ref = jax.block_until_ready(reference_forward(x, params))

    # f32-operand path: tight-tolerance correctness check.
    kparams_f32 = prepare_kernel_params(params, compute_dtype=jnp.float32)
    out_f32 = jax.block_until_ready(linear_forward(x, kparams_f32))
    assert out_f32.shape == (B, 10, 10), out_f32.shape
    assert jnp.allclose(out_f32, ref, atol=1e-4, rtol=1e-4), \
        float(jnp.max(jnp.abs(out_f32 - ref)))

    # bf16-operand path (performance default): loose tolerance (bf16 MXU
    # operands, f32 accumulation/epilogue).
    kparams_bf16 = prepare_kernel_params(params)      # bfloat16 by default
    out_bf16 = jax.block_until_ready(linear_forward(x, kparams_bf16))
    assert out_bf16.shape == (B, 10, 10), out_bf16.shape
    max_err = float(jnp.max(jnp.abs(out_bf16 - ref)))
    tol = 5e-2 * max(1.0, float(jnp.max(jnp.abs(ref))))
    assert max_err < tol, (max_err, tol)

    print("KERNEL_OK")
</pallas_src>

<mosaic_0001>
module attributes {stable_mosaic.version = 11 : i64} {
  func.func @_mlp_kernel(%arg0: i32, %arg1: memref<8x300xf32, #tpu.memory_space<vmem>>, %arg2: memref<300x256xf32, #tpu.memory_space<vmem>>, %arg3: memref<256x128xf32, #tpu.memory_space<vmem>>, %arg4: memref<128x128xf32, #tpu.memory_space<vmem>>, %arg5: memref<1x512xf32, #tpu.memory_space<vmem>>, %arg6: memref<8x128xf32, #tpu.memory_space<vmem>>) attributes {dimension_semantics = [#tpu.dimension_semantics<parallel>], iteration_bounds = array<i64: 2>, scalar_prefetch = 0 : i64, scratch_operands = 0 : i64, tpu.core_type = #tpu.core_type<tc>, window_params = [{transform_indices = @transform_0, window_bounds = array<i64: 8, 300>}, {pipeline_mode = #tpu.pipeline_mode<synchronous>, transform_indices = @transform_1, window_bounds = array<i64: 300, 256>}, {pipeline_mode = #tpu.pipeline_mode<synchronous>, transform_indices = @transform_2, window_bounds = array<i64: 256, 128>}, {pipeline_mode = #tpu.pipeline_mode<synchronous>, transform_indices = @transform_3, window_bounds = array<i64: 128, 128>}, {pipeline_mode = #tpu.pipeline_mode<synchronous>, transform_indices = @transform_4, window_bounds = array<i64: 1, 512>}, {transform_indices = @transform_5, window_bounds = array<i64: 8, 128>}]} {
    %c0 = arith.constant 0 : index
    %c0_0 = arith.constant 0 : index
    %0 = vector.load %arg1[%c0, %c0_0] : memref<8x300xf32, #tpu.memory_space<vmem>>, vector<8x300xf32>
    %c0_1 = arith.constant 0 : index
    %c0_2 = arith.constant 0 : index
    %1 = vector.load %arg5[%c0_1, %c0_2] : memref<1x512xf32, #tpu.memory_space<vmem>>, vector<1x256xf32>
    %c0_3 = arith.constant 0 : index
    %c256 = arith.constant 256 : index
    %2 = vector.load %arg5[%c0_3, %c256] : memref<1x512xf32, #tpu.memory_space<vmem>>, vector<1x128xf32>
    %c0_4 = arith.constant 0 : index
    %c384 = arith.constant 384 : index
    %3 = vector.load %arg5[%c0_4, %c384] : memref<1x512xf32, #tpu.memory_space<vmem>>, vector<1x128xf32>
    %c0_5 = arith.constant 0 : index
    %c0_6 = arith.constant 0 : index
    %4 = vector.load %arg2[%c0_5, %c0_6] : memref<300x256xf32, #tpu.memory_space<vmem>>, vector<300x256xf32>
    %cst = arith.constant dense<0.000000e+00> : vector<8x256xf32>
    %5 = tpu.matmul %0, %4, %cst {dimension_numbers = #tpu.dot_dimension_numbers<[1], [0], [0], [1], [0, 0, 1, 1], [], []>} : vector<8x300xf32>, vector<300x256xf32>, vector<8x256xf32> -> vector<8x256xf32>
    %6 = vector.broadcast %1 : vector<1x256xf32> to vector<8x256xf32>
    %7 = arith.addf %5, %6 : vector<8x256xf32>
    %cst_7 = arith.constant 0.000000e+00 : f32
    %8 = vector.broadcast %cst_7 : f32 to vector<8x256xf32>
    %9 = arith.maximumf %7, %8 : vector<8x256xf32>
    %c0_8 = arith.constant 0 : index
    %c0_9 = arith.constant 0 : index
    %10 = vector.load %arg3[%c0_8, %c0_9] : memref<256x128xf32, #tpu.memory_space<vmem>>, vector<256x128xf32>
    %cst_10 = arith.constant dense<0.000000e+00> : vector<8x128xf32>
    %11 = tpu.matmul %9, %10, %cst_10 {dimension_numbers = #tpu.dot_dimension_numbers<[1], [0], [0], [1], [0, 0, 1, 1], [], []>} : vector<8x256xf32>, vector<256x128xf32>, vector<8x128xf32> -> vector<8x128xf32>
    %12 = vector.broadcast %2 : vector<1x128xf32> to vector<8x128xf32>
    %13 = arith.addf %11, %12 : vector<8x128xf32>
    %cst_11 = arith.constant 0.000000e+00 : f32
    %14 = vector.broadcast %cst_11 : f32 to vector<8x128xf32>
    %15 = arith.maximumf %13, %14 : vector<8x128xf32>
    %c0_12 = arith.constant 0 : index
    %c0_13 = arith.constant 0 : index
    %16 = vector.load %arg4[%c0_12, %c0_13] : memref<128x128xf32, #tpu.memory_space<vmem>>, vector<128x128xf32>
    %cst_14 = arith.constant dense<0.000000e+00> : vector<8x128xf32>
    %17 = tpu.matmul %15, %16, %cst_14 {dimension_numbers = #tpu.dot_dimension_numbers<[1], [0], [0], [1], [0, 0, 1, 1], [], []>} : vector<8x128xf32>, vector<128x128xf32>, vector<8x128xf32> -> vector<8x128xf32>
    %18 = vector.broadcast %3 : vector<1x128xf32> to vector<8x128xf32>
    %19 = arith.addf %17, %18 : vector<8x128xf32>
    %c0_15 = arith.constant 0 : index
    %c0_16 = arith.constant 0 : index
    %20 = vector.load %arg6[%c0_15, %c0_16] : memref<8x128xf32, #tpu.memory_space<vmem>>, vector<8x128xf32>
    tpu.vector_store %arg6[%c0_15, %c0_16], %19 {strides = array<i32>} : memref<8x128xf32, #tpu.memory_space<vmem>>, vector<8x128xf32>,
    return
  }
  func.func @transform_0(%arg0: i32) -> (i32, i32) {
    %c0_i32 = arith.constant 0 : i32
    %c0_i32_0 = arith.constant 0 : i32
    return %arg0, %c0_i32 : i32, i32
  }
  func.func @transform_1(%arg0: i32) -> (i32, i32) {
    %c0_i32 = arith.constant 0 : i32
    %c0_i32_0 = arith.constant 0 : i32
    %c0_i32_1 = arith.constant 0 : i32
    return %c0_i32, %c0_i32_0 : i32, i32
  }
  func.func @transform_2(%arg0: i32) -> (i32, i32) {
    %c0_i32 = arith.constant 0 : i32
    %c0_i32_0 = arith.constant 0 : i32
    %c0_i32_1 = arith.constant 0 : i32
    return %c0_i32, %c0_i32_0 : i32, i32
  }
  func.func @transform_3(%arg0: i32) -> (i32, i32) {
    %c0_i32 = arith.constant 0 : i32
    %c0_i32_0 = arith.constant 0 : i32
    %c0_i32_1 = arith.constant 0 : i32
    return %c0_i32, %c0_i32_0 : i32, i32
  }
  func.func @transform_4(%arg0: i32) -> (i32, i32) {
    %c0_i32 = arith.constant 0 : i32
    %c0_i32_0 = arith.constant 0 : i32
    %c0_i32_1 = arith.constant 0 : i32
    return %c0_i32, %c0_i32_0 : i32, i32
  }
  func.func @transform_5(%arg0: i32) -> (i32, i32) {
    %c0_i32 = arith.constant 0 : i32
    %c0_i32_0 = arith.constant 0 : i32
    return %arg0, %c0_i32 : i32, i32
  }
}

</mosaic_0001>

<bundles_post_ra>
// kernel: linear_forward.1
= control target key start
LH: loop header
LB: loop body
LE: loop exit
PB: predicated region body
PF: predicated region fallthrough
CT: control target
= control target key end

     0   :  { %s1020_s18 = smov 0   ;;  %s1433_s0 = inlined_call_operand.vmem [shape: f32[16,300], index: 0, kind: input, shape index: {}]   ;;  %s1434_s1 = inlined_call_operand.vmem [shape: f32[300,256], index: 1, kind: input, shape index: {}]   ;;  %s1435_s2 = inlined_call_operand.vmem [shape: f32[256,128], index: 2, kind: input, shape index: {}]   ;;  %s1436_s3 = inlined_call_operand.vmem [shape: f32[128,128], index: 3, kind: input, shape index: {}]   ;;  %s1437_s4 = inlined_call_operand.vmem [shape: f32[1,512], index: 4, kind: input, shape index: {}]   ;;  %s1438_s5 = inlined_call_operand.vmem [shape: f32[16,128], index: 5, kind: output, shape index: {}]  }
   0x1 LB: > { %s726_s19 = sadd.s32 4294967295, %s984_s18   ;;  %p730_p0 = scmp.ge.s32.totalorder %s984_s18, 1  ;;  %s984_s18 = sphi %s1020_s18, %s15_s18  }
   0x2   : > { %p187_p1 = scmp.lt.s32.totalorder %s984_s18, 3 }
   0x4   : > { %p188_p2 = pnand %p730_p0, %p187_p1 }
   0x5   : > { %v230_v0 = vld [vmem:[%s1434_s1 + $0x8] sm:$0xff] (!%p188_p2)  ;;  %v232_v1 = vld [vmem:[%s1434_s1 + $0x18] sm:$0xff] (!%p188_p2)  ;;  %v229_v2 = vld [vmem:[%s1434_s1] sm:$0xff] (!%p188_p2)  ;;  %p214_p3 = scmp.lt.s32.totalorder (!%p188_p2), %s726_s19, 1  ;;  %vm320_vm0 = vcmask (!%p188_p2), 1043456   ;;  %vm987_vm1 = vmmov (!%p188_p2), 1  }
   0x6   : > { %191 = sbr.rel (%p188_p2) target bundleno = 736 (0x2e0), region = 40  ;;  %v827_v3 = vpack.c.bf16 (!%p188_p2), %v232_v1, %v230_v0  ;;  %v231_v4 = vld [vmem:[%s1434_s1 + $0x10] sm:$0xff] (!%p188_p2)  ;;  %v234_v5 = vld [vmem:[%s1434_s1 + $0x28] sm:$0xff] (!%p188_p2)  ;;  %v236_v6 = vld [vmem:[%s1434_s1 + $0x38] sm:$0xff] (!%p188_p2)  ;;  %vm316_vm3 = vcmask (!%p188_p2), 359424   ;;  %vm989_vm4 = vmmov (!%p188_p2), 0  }
   0x7   : > { %v829_v7 = vpack.c.bf16 (!%p188_p2), %v231_v4, %v229_v2  ;;  %v831_v8 = vpack.c.bf16 (!%p188_p2), %v236_v6, %v234_v5  ;;  %v233_v9 = vld [vmem:[%s1434_s1 + $0x20] sm:$0xff] (!%p188_p2)  ;;  %v235_v10 = vld [vmem:[%s1434_s1 + $0x30] sm:$0xff] (!%p188_p2)  ;;  %v238_v11 = vld [vmem:[%s1434_s1 + $0x48] sm:$0xff] (!%p188_p2) }
   0x8   : > { %828 = vmatprep.subr.bf16.mxu0 (!%p188_p2), %v827_v3  ;;  %v240_v12 = vld [vmem:[%s1434_s1 + $0x58] sm:$0xff] (!%p188_p2)  ;;  %v833_v13 = vpack.c.bf16 (!%p188_p2), %v235_v10, %v233_v9  ;;  %v237_v15 = vld [vmem:[%s1434_s1 + $0x40] sm:$0xff] (!%p188_p2)  ;;  %v239_v16 = vld [vmem:[%s1434_s1 + $0x50] sm:$0xff] (!%p188_p2) }
   0x9   : > { %830 = vmatpush1.bf16.msra.mxu0 (!%p188_p2), %v829_v7  ;;  %v835_v14 = vpack.c.bf16 (!%p188_p2), %v240_v12, %v238_v11  ;;  %v242_v17 = vld [vmem:[%s1434_s1 + $0x68] sm:$0xff] (!%p188_p2)  ;;  %v244_v18 = vld [vmem:[%s1434_s1 + $0x78] sm:$0xff] (!%p188_p2)  ;;  %v837_v19 = vpack.c.bf16 (!%p188_p2), %v239_v16, %v237_v15  ;;  %v241_v21 = vld [vmem:[%s1434_s1 + $0x60] sm:$0xff] (!%p188_p2) }
   0xa   : > { %832 = vmatprep.subr.bf16.mxu0 (!%p188_p2), %v831_v8  ;;  %v839_v20 = vpack.c.bf16 (!%p188_p2), %v244_v18, %v242_v17  ;;  %v243_v22 = vld [vmem:[%s1434_s1 + $0x70] sm:$0xff] (!%p188_p2)  ;;  %v246_v23 = vld [vmem:[%s1434_s1 + $0x88] sm:$0xff] (!%p188_p2)  ;;  %v248_v24 = vld [vmem:[%s1434_s1 + $0x98] sm:$0xff] (!%p188_p2) }
   0xb   : > { %v841_v25 = vpack.c.bf16 (!%p188_p2), %v243_v22, %v241_v21  ;;  %v843_v26 = vpack.c.bf16 (!%p188_p2), %v248_v24, %v246_v23  ;;  %v245_v27 = vld [vmem:[%s1434_s1 + $0x80] sm:$0xff] (!%p188_p2)  ;;  %v247_v28 = vld [vmem:[%s1434_s1 + $0x90] sm:$0xff] (!%p188_p2)  ;;  %v250_v29 = vld [vmem:[%s1434_s1 + $0xa8] sm:$0xff] (!%p188_p2) }
   0xc   : > { %v252_v30 = vld [vmem:[%s1434_s1 + $0xb8] sm:$0xff] (!%p188_p2)  ;;  %v845_v31 = vpack.c.bf16 (!%p188_p2), %v247_v28, %v245_v27  ;;  %v249_v33 = vld [vmem:[%s1434_s1 + $0xa0] sm:$0xff] (!%p188_p2)  ;;  %v251_v34 = vld [vmem:[%s1434_s1 + $0xb0] sm:$0xff] (!%p188_p2) }
   0xd   : > { %834 = vmatpush1.bf16.msra.mxu0 %v833_v13  ;;  %s1440_s19 = smov (!%p214_p3, %s726_s19), 1  ;;  %v847_v32 = vpack.c.bf16 %v252_v30, %v250_v29  ;;  %v254_v35 = vld [vmem:[%s1434_s1 + $0xc8] sm:$0xff]  ;;  %v256_v36 = vld [vmem:[%s1434_s1 + $0xd8] sm:$0xff]  ;;  %v849_v37 = vpack.c.bf16 %v251_v34, %v249_v33  ;;  %v253_v39 = vld [vmem:[%s1434_s1 + $0xc0] sm:$0xff] }
   0xe   : > { %836 = vmatprep.subr.bf16.mxu0 %v835_v14  ;;  %s965_s16 = smul.u32 24, %s1440_s19  ;;  %v851_v38 = vpack.c.bf16 %v256_v36, %v254_v35  ;;  %v255_v40 = vld [vmem:[%s1434_s1 + $0xd0] sm:$0xff]  ;;  %v258_v42 = vld [vmem:[%s1434_s1 + $0xe8] sm:$0xff]  ;;  %v260_v43 = vld [vmem:[%s1434_s1 + $0xf8] sm:$0xff]  ;;  %s732_s30 = sshll.u32 %s1440_s19, 3 }
   0xf   : > { %v853_v44 = vpack.c.bf16 %v255_v40, %v253_v39  ;;  %v855_v45 = vpack.c.bf16 %v260_v43, %v258_v42  ;;  %v257_v46 = vld [vmem:[%s1434_s1 + $0xe0] sm:$0xff]  ;;  %v259_v47 = vld [vmem:[%s1434_s1 + $0xf0] sm:$0xff]  ;;  %v262_v48 = vld [vmem:[%s1434_s1 + $0x108] sm:$0xff]  ;;  %s222_s10 = scalar_lea.vmem %s1438_s5, %s732_s30 }
  0x10   : > { %s1116_s29 = scalar_lea.vmem %s1433_s0, %s965_s16  ;;  %v264_v49 = vld [vmem:[%s1434_s1 + $0x118] sm:$0xff]  ;;  %v487_v50 = vld [vmem:[%s1435_s2 + $0x80] sm:$0xff]  ;;  %v263_v52 = vld [vmem:[%s1434_s1 + $0x110] sm:$0xff]  ;;  %v857_v56 = vpack.c.bf16 %v259_v47, %v257_v46 }
  0x11   : > { %838 = vmatpush1.bf16.msra.mxu0 %v837_v19  ;;  %v224_v41 = vld [vmem:[%s1116_s29 + $0x8] sm:$0xff]  ;;  %v261_v51 = vld [vmem:[%s1434_s1 + $0x100] sm:$0xff]  ;;  %v489_v59 = vld [vmem:[%s1435_s2 + $0x90] sm:$0xff]  ;;  %v859_v62 = vpack.c.bf16 %v264_v49, %v262_v48 }
  0x12   : > { %840 = vmatprep.subr.bf16.mxu0 %v839_v20  ;;  %391 = vmatprep.mubr.f32.mxu0 %v224_v41  ;;  %v488_v53 = vld [vmem:[%s1435_s2 + $0x88] sm:$0xff]  ;;  %v471_v54 = vld [vmem:[%s1435_s2] sm:$0xff]  ;;  %v490_v60 = vld [vmem:[%s1435_s2 + $0x98] sm:$0xff]  ;;  %v861_v6 = vpack.c.bf16 %v263_v52, %v261_v51 }
  0x13   : > { %v472_v55 = vld [vmem:[%s1435_s2 + $0x8] sm:$0xff]  ;;  %v905_v57 = vpack.c.bf16 %v488_v53, %v487_v50  ;;  %v473_v61 = vld [vmem:[%s1435_s2 + $0x10] sm:$0xff]  ;;  %v909_v63 = vpack.c.bf16 %v490_v60, %v489_v59  ;;  %v474_v0 = vld [vmem:[%s1435_s2 + $0x18] sm:$0xff] }
  0x14   : > { %v907_v58 = vpack.c.bf16 %v472_v55, %v471_v54  ;;  %v491_v1 = vld [vmem:[%s1435_s2 + $0xa0] sm:$0xff]  ;;  %v492_v2 = vld [vmem:[%s1435_s2 + $0xa8] sm:$0xff]  ;;  %v268_v4 = vld [vmem:[%s1434_s1 + $0x138] sm:$0xff]  ;;  %v911_v5 = vpack.c.bf16 %v474_v0, %v473_v61 }
  0x15   : > { %842 = vmatpush1.bf16.msra.mxu0 %v841_v25  ;;  %v266_v3 = vld [vmem:[%s1434_s1 + $0x128] sm:$0xff]  ;;  %906 = vmatprep.subr.bf16.mxu1 %v905_v57  ;;  %v265_v7 = vld [vmem:[%s1434_s1 + $0x120] sm:$0xff]  ;;  %v913_v8 = vpack.c.bf16 %v492_v2, %v491_v1  ;;  %v267_v12 = vld [vmem:[%s1434_s1 + $0x130] sm:$0xff] }
  0x16   : > { %844 = vmatprep.subr.bf16.mxu0 %v843_v26  ;;  %908 = vmatpush3.bf16.msra.mxu1 %v907_v58  ;;  %v475_v9 = vld [vmem:[%s1435_s2 + $0x20] sm:$0xff]  ;;  %v476_v10 = vld [vmem:[%s1435_s2 + $0x28] sm:$0xff]  ;;  %v863_v11 = vpack.c.bf16 %v268_v4, %v266_v3  ;;  %v493_v13 = vld [vmem:[%s1435_s2 + $0xb0] sm:$0xff]  ;;  %v865_v18 = vpack.c.bf16 %v267_v12, %v265_v7 }
  0x17   : > { %910 = vmatprep.subr.bf16.mxu1 %v909_v63  ;;  %v494_v14 = vld [vmem:[%s1435_s2 + $0xb8] sm:$0xff]  ;;  %v270_v15 = vld [vmem:[%s1434_s1 + $0x148] sm:$0xff]  ;;  %v915_v17 = vpack.c.bf16 %v476_v10, %v475_v9  ;;  %v269_v19 = vld [vmem:[%s1434_s1 + $0x140] sm:$0xff] }
  0x18   : > { %v272_v16 = vld [vmem:[%s1434_s1 + $0x158] sm:$0xff]  ;;  %v917_v20 = vpack.c.bf16 %v494_v14, %v493_v13  ;;  %v477_v21 = vld [vmem:[%s1435_s2 + $0x30] sm:$0xff]  ;;  %v495_v25 = vld [vmem:[%s1435_s2 + $0xc0] sm:$0xff] }
  0x19   : > { %846 = vmatpush1.bf16.msra.mxu0 %v845_v31  ;;  %v478_v22 = vld [vmem:[%s1435_s2 + $0x38] sm:$0xff]  ;;  %v867_v23 = vpack.c.bf16 %v272_v16, %v270_v15  ;;  %v271_v24 = vld [vmem:[%s1434_s1 + $0x150] sm:$0xff]  ;;  %v496_v26 = vld [vmem:[%s1435_s2 + $0xc8] sm:$0xff] }
  0x1a   : > { %848 = vmatprep.subr.bf16.mxu0 %v847_v32  ;;  %912 = vmatpush3.bf16.msra.mxu1 %v911_v5  ;;  %v274_v27 = vld [vmem:[%s1434_s1 + $0x168] sm:$0xff]  ;;  %v276_v28 = vld [vmem:[%s1434_s1 + $0x178] sm:$0xff]  ;;  %v919_v29 = vpack.c.bf16 %v478_v22, %v477_v21  ;;  %v869_v30 = vpack.c.bf16 %v271_v24, %v269_v19  ;;  %v273_v31 = vld [vmem:[%s1434_s1 + $0x160] sm:$0xff]  ;;  %v921_v32 = vpack.c.bf16 %v496_v26, %v495_v25 }
  0x1b   : > { %914 = vmatprep.subr.bf16.mxu1 %v913_v8  ;;  %v479_v33 = vld [vmem:[%s1435_s2 + $0x40] sm:$0xff]  ;;  %v480_v34 = vld [vmem:[%s1435_s2 + $0x48] sm:$0xff]  ;;  %v871_v35 = vpack.c.bf16 %v276_v28, %v274_v27  ;;  %v275_v36 = vld [vmem:[%s1434_s1 + $0x170] sm:$0xff] }
  0x1c   : > { %v278_v39 = vld [vmem:[%s1434_s1 + $0x188] sm:$0xff]  ;;  %v280_v40 = vld [vmem:[%s1434_s1 + $0x198] sm:$0xff]  ;;  %v923_v41 = vpack.c.bf16 %v480_v34, %v479_v33  ;;  %v873_v42 = vpack.c.bf16 %v275_v36, %v273_v31  ;;  %v277_v43 = vld [vmem:[%s1434_s1 + $0x180] sm:$0xff] }
  0x1d   : > { %850 = vmatpush1.bf16.msra.mxu0 %v849_v37  ;;  %v497_v37 = vld [vmem:[%s1435_s2 + $0xd0] sm:$0xff]  ;;  %v482_v46 = vld [vmem:[%s1435_s2 + $0x58] sm:$0xff]  ;;  %v875_v47 = vpack.c.bf16 %v280_v40, %v278_v39  ;;  %v499_v49 = vld [vmem:[%s1435_s2 + $0xe0] sm:$0xff]  ;;  %v306_v39 = vlaneseq }
  0x1e   : > { %852 = vmatprep.subr.bf16.mxu0 %v851_v38  ;;  %916 = vmatpush3.bf16.msra.mxu1 %v915_v17  ;;  %v498_v38 = vld [vmem:[%s1435_s2 + $0xd8] sm:$0xff]  ;;  %v279_v48 = vld [vmem:[%s1434_s1 + $0x190] sm:$0xff]  ;;  %v500_v50 = vld [vmem:[%s1435_s2 + $0xe8] sm:$0xff] }
  0x1f   : > { %918 = vmatprep.subr.bf16.mxu1 %v917_v20  ;;  %v282_v51 = vld [vmem:[%s1434_s1 + $0x1a8] sm:$0xff]  ;;  %v284_v52 = vld [vmem:[%s1434_s1 + $0x1b8] sm:$0xff]  ;;  %v877_v54 = vpack.c.bf16 %v279_v48, %v277_v43  ;;  %v929_v55 = vpack.c.bf16 %v500_v50, %v499_v49  ;;  %v281_v57 = vld [vmem:[%s1434_s1 + $0x1a0] sm:$0xff]  ;;  %v307_v40 = vshrl.u32 %v306_v39, 7 }
  0x20   : > { %v283_v58 = vld [vmem:[%s1434_s1 + $0x1b0] sm:$0xff]  ;;  %v286_v59 = vld [vmem:[%s1434_s1 + $0x1c8] sm:$0xff]  ;;  %v288_v60 = vld [vmem:[%s1434_s1 + $0x1d8] sm:$0xff] }
  0x21   : > { %854 = vmatpush1.bf16.msra.mxu0 %v853_v44  ;;  %v925_v44 = vpack.c.bf16 %v498_v38, %v497_v37  ;;  %v881_v61 = vpack.c.bf16 %v283_v58, %v281_v57  ;;  %v285_v63 = vld [vmem:[%s1434_s1 + $0x1c0] sm:$0xff]  ;;  %v287_v0 = vld [vmem:[%s1434_s1 + $0x1d0] sm:$0xff]  ;;  %v290_v1 = vld [vmem:[%s1434_s1 + $0x1e8] sm:$0xff]  ;;  %v988_v38 = vmov 0.0|0.0   ;;  %v312_v43 = vsub.s32 1, %v307_v40 }
  0x22   : > { %856 = vmatprep.subr.bf16.mxu0 %v855_v45  ;;  %920 = vmatpush3.bf16.msra.mxu1 %v919_v29  ;;  %v481_v45 = vld [vmem:[%s1435_s2 + $0x50] sm:$0xff]  ;;  %v292_v2 = vld [vmem:[%s1434_s1 + $0x1f8] sm:$0xff]  ;;  %v885_v3 = vpack.c.bf16 %v287_v0, %v285_v63  ;;  %v289_v5 = vld [vmem:[%s1434_s1 + $0x1e0] sm:$0xff] }
  0x23   : > { %922 = vmatprep.subr.bf16.mxu1 %v921_v32  ;;  %v927_v53 = vpack.c.bf16 %v482_v46, %v481_v45  ;;  %v887_v4 = vpack.c.bf16 %v292_v2, %v290_v1  ;;  %v294_v7 = vld [vmem:[%s1434_s1 + $0x208] sm:$0xff]  ;;  %v296_v8 = vld [vmem:[%s1434_s1 + $0x218] sm:$0xff]  ;;  %v295_v12 = vld [vmem:[%s1434_s1 + $0x210] sm:$0xff] }
  0x24   : > { %v891_v10 = vpack.c.bf16 %v296_v8, %v294_v7  ;;  %v298_v13 = vld [vmem:[%s1434_s1 + $0x228] sm:$0xff]  ;;  %v300_v14 = vld [vmem:[%s1434_s1 + $0x238] sm:$0xff]  ;;  %v223_v15 = vld [vmem:[%s1116_s29] sm:$0xff] }
  0x25   : > { %858 = vmatpush1.bf16.msra.mxu0 %v857_v56  ;;  %v879_v56 = vpack.c.bf16 %v284_v52, %v282_v51  ;;  %v895_v17 = vpack.c.bf16 %v300_v14, %v298_v13  ;;  %v299_v19 = vld [vmem:[%s1434_s1 + $0x230] sm:$0xff]  ;;  %v302_v20 = vld [vmem:[%s1434_s1 + $0x248] sm:$0xff]  ;;  %v304_v21 = vld [vmem:[%s1434_s1 + $0x258] sm:$0xf] }
  0x26   : > { %860 = vmatprep.subr.bf16.mxu0 %v859_v62  ;;  %924 = vmatpush3.bf16.msra.mxu1 %v923_v41  ;;  %v883_v62 = vpack.c.bf16 %v288_v60, %v286_v59  ;;  %v899_v24 = vpack.c.bf16 %v304_v21, %v302_v20  ;;  %v301_v25 = vld [vmem:[%s1434_s1 + $0x240] sm:$0xff]  ;;  %v303_v26 = vld [vmem:[%s1434_s1 + $0x250] sm:$0xf]  ;;  %vm900_vm2 = vmpackc.low %vm320_vm0, %vm987_vm1  ;;  %v308_v41 = vsub.s32 0, %v307_v40 }
  0x27   : > { %926 = vmatprep.subr.bf16.mxu1 %v925_v44  ;;  %v902_v27 = vpack.c.bf16 %v303_v26, %v301_v25  ;;  %v225_v28 = vld [vmem:[%s1116_s29 + $0x10] sm:$0xff]  ;;  %v483_v29 = vld [vmem:[%s1435_s2 + $0x60] sm:$0xff]  ;;  %v502_v33 = vld [vmem:[%s1435_s2 + $0xf8] sm:$0xff] }
  0x28   : > { %v501_v32 = vld [vmem:[%s1435_s2 + $0xf0] sm:$0xff]  ;;  %v486_v36 = vld [vmem:[%s1435_s2 + $0x78] sm:$0xff]  ;;  %v580_v49 = vld [vmem:[%s1436_s3] sm:$0xff] }
  0x29   : > { %862 = vmatpush1.bf16.msra.mxu0 %v861_v6  ;;  %v291_v6 = vld [vmem:[%s1434_s1 + $0x1f0] sm:$0xff]  ;;  %v933_v34 = vpack.c.bf16 %v502_v33, %v501_v32  ;;  %v581_v50 = vld [vmem:[%s1436_s3 + $0x8] sm:$0xff]  ;;  %v584_v58 = vld [vmem:[%s1436_s3 + $0x20] sm:$0xff] }
  0x2a   : > { %864 = vmatprep.subr.bf16.mxu0 %v863_v11  ;;  %928 = vmatpush3.bf16.msra.mxu1 %v927_v53  ;;  %v889_v9 = vpack.c.bf16 %v291_v6, %v289_v5  ;;  %v293_v11 = vld [vmem:[%s1434_s1 + $0x200] sm:$0xff]  ;;  %v938_v53 = vpack.c.bf16 %v581_v50, %v580_v49  ;;  %v585_v59 = vld [vmem:[%s1436_s3 + $0x28] sm:$0xff] }
  0x2b   : > { %930 = vmatprep.subr.bf16.mxu1 %v929_v55  ;;  %v893_v16 = vpack.c.bf16 %v295_v12, %v293_v11  ;;  %v582_v55 = vld [vmem:[%s1436_s3 + $0x10] sm:$0xff]  ;;  %v944_v60 = vpack.c.bf16 %v585_v59, %v584_v58  ;;  %v588_v0 = vld [vmem:[%s1436_s3 + $0x40] sm:$0xff]  ;;  %v589_v1 = vld [vmem:[%s1436_s3 + $0x48] sm:$0xff] }
  0x2c   : > { %v950_v2 = vpack.c.bf16 %v589_v1, %v588_v0  ;;  %v592_v6 = vld [vmem:[%s1436_s3 + $0x60] sm:$0xff]  ;;  %v593_v7 = vld [vmem:[%s1436_s3 + $0x68] sm:$0xff] }
  0x2d   : > { %866 = vmatpush1.bf16.msra.mxu0 %v865_v18  ;;  %v297_v18 = vld [vmem:[%s1434_s1 + $0x220] sm:$0xff]  ;;  %v956_v8 = vpack.c.bf16 %v593_v7, %v592_v6 }
  0x2e   : > { %868 = vmatprep.subr.bf16.mxu0 %v867_v23  ;;  %v897_v22 = vpack.c.bf16 %v299_v19, %v297_v18  ;;  %v986_v23 = vmov 0.0   ;;  %v736_v13 = vld [vmem:[%s1437_s4 + $0x2] ss:$0 sm:$0xff]  ;;  %v737_v18 = vld [vmem:[%s1437_s4 + $0x3] ss:$0 sm:$0xff] }
  0x31   : > { %870 = vmatpush1.bf16.msra.mxu0 %v869_v30  ;;  %v484_v30 = vld [vmem:[%s1435_s2 + $0x68] sm:$0xff] }
  0x32   : > { %872 = vmatprep.subr.bf16.mxu0 %v871_v35  ;;  %v931_v31 = vpack.c.bf16 %v484_v30, %v483_v29  ;;  %v485_v35 = vld [vmem:[%s1435_s2 + $0x70] sm:$0xff] }
  0x33   : > { %v935_v37 = vpack.c.bf16 %v486_v36, %v485_v35 }
  0x34   : > { %932 = vmatpush3.bf16.msra.mxu1 %v931_v31 }
  0x35   : > { %874 = vmatpush1.bf16.msra.mxu0 %v873_v42  ;;  %934 = vmatprep.subr.bf16.mxu1 %v933_v34  ;;  %v226_v42 = vld [vmem:[%s1437_s4] sm:$0x3] }
  0x36   : > { %876 = vmatprep.subr.bf16.mxu0 %v875_v47  ;;  %v309_v44 = vrot.slane %v226_v42, %v308_v41  ;;  %v313_v45 = vrot.slane %v226_v42, %v312_v43 }
  0x38   : > { %936 = vmatpush3.bf16.msra.mxu1 %v935_v37 }
  0x39   : > { %878 = vmatpush1.bf16.msra.mxu0 %v877_v54  ;;  %937 = vmatprep.subr.bf16.mxu1 %v988_v38 }
  0x3a   : > { %880 = vmatprep.subr.bf16.mxu0 %v879_v56  ;;  %v583_v56 = vld [vmem:[%s1436_s3 + $0x18] sm:$0xff] }
  0x3b   : > { %v941_v57 = vpack.c.bf16 %v583_v56, %v582_v55 }
  0x3d   : > { %882 = vmatpush1.bf16.msra.mxu0 %v881_v61  ;;  %v586_v61 = vld [vmem:[%s1436_s3 + $0x30] sm:$0xff] }
  0x3e   : > { %884 = vmatprep.subr.bf16.mxu0 %v883_v62  ;;  %v587_v62 = vld [vmem:[%s1436_s3 + $0x38] sm:$0xff] }
  0x3f   : > { %v947_v63 = vpack.c.bf16 %v587_v62, %v586_v61 }
  0x41   : > { %886 = vmatpush1.bf16.msra.mxu0 %v885_v3  ;;  %v590_v3 = vld [vmem:[%s1436_s3 + $0x50] sm:$0xff] }
  0x42   : > { %888 = vmatprep.subr.bf16.mxu0 %v887_v4  ;;  %v591_v4 = vld [vmem:[%s1436_s3 + $0x58] sm:$0xff] }
  0x43   : > { %v953_v5 = vpack.c.bf16 %v591_v4, %v590_v3 }
  0x45   : > { %890 = vmatpush1.bf16.msra.mxu0 %v889_v9  ;;  %v594_v9 = vld [vmem:[%s1436_s3 + $0x70] sm:$0xff] }
  0x46   : > { %892 = vmatprep.subr.bf16.mxu0 %v891_v10  ;;  %v595_v10 = vld [vmem:[%s1436_s3 + $0x78] sm:$0xff] }
  0x47   : > { %v959_v11 = vpack.c.bf16 %v595_v10, %v594_v9 }
  0x48   : > { %392 = vmatmul.mubr.f32.vlgmr.msra.gmra.mrb[0].mxu0 %v223_v15 }
  0x49   : > { %894 = vmatpush1.bf16.msra.mxu0 %v893_v16  ;;  %462 = vmatprep.mubr.f32.mxu0 %v986_v23 }
  0x4a   : > { %896 = vmatprep.subr.bf16.mxu0 %v895_v17 }
  0x4d   : > { %898 = vmatpush1.bf16.msra.mxu0 %v897_v22 }
  0x4e   : > { %901 = vmatprep.subr.msk.bf16.mxu0 %vm900_vm2, %v899_v24 }
  0x51   : > { %904 = vmatpush1.bf16.msk.msra.mxu0 %vm900_vm2, %v902_v27 }
  0x54   : > { %735 = vmatmul.mubr.msk.f32.vlgmr.msra.gmra.mrb[0].mxu0 %vm316_vm3, %v225_v28 }
 0x127   : > { %v464_v46 = vpop.f32.mrb[0].mxu0 }
 0x128   : > { %v961_v47 = vadd.f32 %v464_v46, %v309_v44  ;;  %v466_v48 = vpop.f32.mrb[1].mxu0 }
 0x129   : > { %v962_v51 = vadd.f32 %v466_v48, %v313_v45 }
 0x12a   : > { %v469_v54 = vmax.f32 %v961_v47, 0.0 }
 0x12b   : > { %v470_v52 = vmax.f32 %v962_v51, 0.0 }
 0x12d   : > { %573 = vmatprep.mubr.f32.mxu1 %v470_v52 }
 0x12e   : > { %574 = vmatmul.mubr.f32.vlgmr.msra.gmra.mrb[0].mxu1 %v469_v54 }
 0x12f   : > { %939 = vmatpush3.bf16.msra.mxu1 %v938_v53  ;;  %824 = vmatprep.mubr.msk.f32.mxu1 %vm989_vm4, %v986_v23 }
 0x130   : > { %940 = vmatprep.subr.bf16.mxu1 %v988_v38 }
 0x133   : > { %942 = vmatpush3.bf16.msra.mxu1 %v941_v57 }
 0x134   : > { %943 = vmatprep.subr.bf16.mxu1 %v988_v38 }
 0x137   : > { %945 = vmatpush3.bf16.msra.mxu1 %v944_v60 }
 0x138   : > { %946 = vmatprep.subr.bf16.mxu1 %v988_v38 }
 0x13b   : > { %948 = vmatpush3.bf16.msra.mxu1 %v947_v63 }
 0x13c   : > { %949 = vmatprep.subr.bf16.mxu1 %v988_v38 }
 0x13f   : > { %951 = vmatpush3.bf16.msra.mxu1 %v950_v2 }
 0x140   : > { %952 = vmatprep.subr.bf16.mxu1 %v988_v38 }
 0x143   : > { %954 = vmatpush3.bf16.msra.mxu1 %v953_v5 }
 0x144   : > { %955 = vmatprep.subr.bf16.mxu1 %v988_v38 }
 0x147   : > { %957 = vmatpush3.bf16.msra.mxu1 %v956_v8 }
 0x148   : > { %958 = vmatprep.subr.bf16.mxu1 %v988_v38 }
 0x14b   : > { %960 = vmatpush3.bf16.msra.mxu1 %v959_v11 }
 0x201   : > { %v772_v12 = vpop.f32.mrb[0].mxu1 }
 0x202   : > { %v773_v14 = vpop.f32.mrb[1].mxu1 }
 0x203   : > { %v774_v15 = vadd.f32 %v773_v14, %v772_v12 }
 0x205   : > { %v576_v16 = vadd.f32 %v774_v15, %v736_v13 }
 0x207   : > { %v579_v17 = vmax.f32 %v576_v16, 0.0 }
 0x209   : > { %825 = vmatmul.mubr.f32.vlgmr.msra.gmra.mrb[2].mxu1 %v579_v17 }
 0x2dc   : > { %v668_v19 = vpop.f32.mrb[2].mxu1 }
 0x2dd   : > { %v669_v20 = vadd.f32 %v737_v18, %v668_v19  ;;  %v826_v21 = vpop.f32.mrb[3].mxu1 }
 0x2df   : > { %672 = vst [vmem:[%s222_s10] sm:$0xff] %v669_v20 }
 0x2e0 PF: > { %s15_s18 = sadd.s32 1, %s984_s18  }
 0x2e1   : > { %p12_p4 = scmp.ge.s32.totalorder %s15_s18, 4  }
 0x2e3   :  { %14 = sbr.rel (!%p12_p4) target bundleno = 1 (0x1), region = 70 }

</bundles_post_ra>
